<compile_context>
chip_gen: v7x
topology: tpu7x:2x2x1
jax: 0.10.0
libtpu: 0.0.40
codegen_flags: <defaults>
</compile_context>

<pallas_src>
import jax
import jax.numpy as jnp
from jax.experimental import pallas as pl
from jax.experimental.pallas import tpu as pltpu


# ---------------------------------------------------------------------------
# Fused Pallas kernel: conv1+bn1+relu -> conv2+bn2 -> (+shortcut) -> relu
# ---------------------------------------------------------------------------
def _make_fused_block_kernel(H, W, Cin, Cmid, Cout, stride, nb, has_shortcut):
    H1 = (H + 2 - 3) // stride + 1
    W1 = (W + 2 - 3) // stride + 1
    Lin = W * Cin          # lane width of the lane-folded input rows
    Lmid = W1 * Cmid       # lane width of the intermediate activation rows
    Lout = W1 * Cout       # lane width of the output rows
    M = nb * H1            # matmul M dim per grid step
    ACT = jnp.bfloat16     # activation / scratch dtype fed to the MXU

    def row_window(ref, kh, s):
        """Rows kh + s*oh, oh in [0, H1), of a (nb, Hp, L) scratch/block ref,
        flattened to the (M, L) matmul LHS."""
        if s == 1:
            v = ref[:, kh:kh + H1, :]
        else:
            # TODO(synk): strided sublane gather; space-to-depth this path in
            # the wrapper so stride!=1 blocks also get unit-stride loads
            # (perf only; not exercised by the tests below).
            v = ref[:, kh:kh + s * (H1 - 1) + 1, :][:, ::s, :]
        return v.reshape(M, v.shape[-1])

    def kernel(x_ref, w1_ref, b1_ref, w2_ref, b2_ref, *rest):
        if has_shortcut:
            ws_ref, bs_ref, o_ref, xpad_ref, mid_ref = rest
        else:
            o_ref, xpad_ref, mid_ref = rest

        # Zero only the 1-row halos (interiors are fully overwritten below).
        # Not gated on program_id: megacore shards may start at a nonzero id.
        zrow_in = jnp.zeros((nb, 1, Lin), ACT)
        zrow_mid = jnp.zeros((nb, 1, Lmid), ACT)
        xpad_ref[:, 0:1, :] = zrow_in
        xpad_ref[:, H + 1:H + 2, :] = zrow_in
        mid_ref[:, 0:1, :] = zrow_mid
        mid_ref[:, H1 + 1:H1 + 2, :] = zrow_mid

        # Stage the input once in bf16 (single cast, lane-dense rows).
        xpad_ref[:, 1:1 + H, :] = x_ref[...].astype(ACT)

        # Bias rows hoisted out of any loop (loaded/broadcast once per step).
        b1 = b1_ref[...]          # (1, Lmid) f32
        b2 = b2_ref[...]          # (1, Lout) f32

        # ---- conv1 (3x3, stride) + bn1 + relu: 3 lane-dense band matmuls -----
        acc1 = jnp.dot(row_window(xpad_ref, 0, stride), w1_ref[0],
                       preferred_element_type=jnp.float32)
        for kh in range(1, 3):
            acc1 = acc1 + jnp.dot(row_window(xpad_ref, kh, stride), w1_ref[kh],
                                  preferred_element_type=jnp.float32)
        out1 = jnp.maximum(acc1 + b1, 0.0)                       # (M, Lmid) f32
        mid_ref[:, 1:1 + H1, :] = out1.reshape(nb, H1, Lmid).astype(ACT)

        # ---- conv2 (3x3, stride 1) + bn2 --------------------------------------
        acc2 = jnp.dot(row_window(mid_ref, 0, 1), w2_ref[0],
                       preferred_element_type=jnp.float32)
        for kh in range(1, 3):
            acc2 = acc2 + jnp.dot(row_window(mid_ref, kh, 1), w2_ref[kh],
                                  preferred_element_type=jnp.float32)
        y = acc2 + b2                                            # (M, Lout) f32

        # ---- shortcut branch ---------------------------------------------------
        if has_shortcut:
            if stride == 1:
                xs = xpad_ref[:, 1:1 + H1, :].reshape(M, Lin)    # already bf16
            else:
                xs = row_window(xpad_ref, 1, stride)             # rows 1 + s*oh
            sc = jnp.dot(xs, ws_ref[...],
                         preferred_element_type=jnp.float32) + bs_ref[...]
        else:
            sc = x_ref[...].reshape(M, Lout)                     # identity (f32)

        # ---- residual add + relu + lane-dense store ---------------------------
        o_ref[...] = jnp.maximum(y + sc, 0.0).reshape(nb, H1, Lout).astype(
            o_ref.dtype)

    return kernel


def fused_packed_basic_block(x_rows, w1_band, b1_row, w2_band, b2_row,
                             ws_band=None, bs_row=None, *, H, W, Cin,
                             stride=1, max_batch_block=8):
    """Whole BasicBlock forward on lane-folded activations.

    x_rows  : (N, H, W*Cin)                 float32
    w1_band : (3, W*Cin,  W1*Cmid)          bf16 (BN1 scale folded, W-pad folded)
    b1_row  : (1, W1*Cmid)                  float32 (BN1 shift tiled over W1)
    w2_band : (3, W1*Cmid, W1*Cout)         bf16
    b2_row  : (1, W1*Cout)                  float32
    ws_band : optional (W*Cin, W1*Cout)     bf16 (1x1 shortcut band)
    bs_row  : optional (1, W1*Cout)         float32
    returns : (N, H1, W1*Cout)              float32
    """
    N = x_rows.shape[0]
    H1 = (H + 2 - 3) // stride + 1
    W1 = (W + 2 - 3) // stride + 1
    Cmid = w1_band.shape[-1] // W1
    Cout = w2_band.shape[-1] // W1
    has_shortcut = ws_band is not None

    weight_args = [w1_band, b1_row, w2_band, b2_row]
    if has_shortcut:
        weight_args += [ws_band, bs_row]
    wbytes = sum(int(a.size) * a.dtype.itemsize for a in weight_args)

    def step_bytes(cand):
        io = 4 * cand * (H * W * Cin + H1 * W1 * Cout)            # f32 in/out
        scratch = 2 * cand * ((H + 2) * W * Cin + (H1 + 2) * W1 * Cmid)  # bf16
        # Only the per-step in/out blocks are double-buffered; weights (constant
        # index_map) and scratch are single instances.
        return 2 * io + wbytes + scratch

    # TODO(synk): per-generation budgets (v5e/v6e have 128 MiB VMEM and can take
    # ~48 MiB steps; v7x only 64 MiB) -- conservative cross-generation defaults.
    budget = 16 * 1024 * 1024
    nb = 1
    for cand in range(min(N, max_batch_block), 0, -1):
        if N % cand:
            continue
        if N // cand < min(2, N):        # keep >= 2 grid steps (v7x has 2 TCs)
            continue
        if step_bytes(cand) <= budget:
            nb = cand
            break
    vmem_limit = int(min(32 << 20, max(16 << 20, 2 * step_bytes(nb))))

    kernel = _make_fused_block_kernel(H, W, Cin, Cmid, Cout, stride, nb,
                                      has_shortcut)

    in_specs = [
        pl.BlockSpec((nb, H, W * Cin), lambda b: (b, 0, 0)),
        pl.BlockSpec((3, W * Cin, W1 * Cmid), lambda b: (0, 0, 0)),
        pl.BlockSpec((1, W1 * Cmid), lambda b: (0, 0)),
        pl.BlockSpec((3, W1 * Cmid, W1 * Cout), lambda b: (0, 0, 0)),
        pl.BlockSpec((1, W1 * Cout), lambda b: (0, 0)),
    ]
    args = [x_rows, w1_band, b1_row, w2_band, b2_row]
    if has_shortcut:
        in_specs += [pl.BlockSpec((W * Cin, W1 * Cout), lambda b: (0, 0)),
                     pl.BlockSpec((1, W1 * Cout), lambda b: (0, 0))]
        args += [ws_band, bs_row]

    return pl.pallas_call(
        kernel,
        out_shape=jax.ShapeDtypeStruct((N, H1, W1 * Cout), jnp.float32),
        grid_spec=pltpu.PrefetchScalarGridSpec(
            num_scalar_prefetch=0,
            grid=(N // nb,),
            in_specs=in_specs,
            out_specs=pl.BlockSpec((nb, H1, W1 * Cout), lambda b: (b, 0, 0)),
            scratch_shapes=[
                pltpu.VMEM((nb, H + 2, W * Cin), jnp.bfloat16),     # padded x
                pltpu.VMEM((nb, H1 + 2, W1 * Cmid), jnp.bfloat16),  # padded out1
            ],
        ),
        compiler_params=pltpu.CompilerParams(
            dimension_semantics=("parallel",),
            vmem_limit_bytes=vmem_limit),
    )(*args)


# ---------------------------------------------------------------------------
# Layout / parameter glue (plain JAX, runs once at init)
# ---------------------------------------------------------------------------
def _grouped_to_dense(w, G):
    """torch grouped-conv weight (Cout_ext, Cin_g, K, K) -> block-diagonal dense
    weight (K, K, Cin_ext, Cout_ext)."""
    cout_ext, cin_g, K, _ = w.shape
    cout_g = cout_ext // G
    wg = w.reshape(G, cout_g, cin_g, K, K).transpose(3, 4, 0, 2, 1)  # (K,K,G,ci,co)
    eye = jnp.eye(G, dtype=w.dtype)
    dense = jnp.einsum('abgic,gh->abgihc', wg, eye)                  # (K,K,G,ci,G,co)
    return dense.reshape(K, K, G * cin_g, G * cout_g)


def _fold_bn_scale(dense_w, bn, eps):
    """Fold BN scale into the dense conv weight; return (w_f32, shift_f32)."""
    gamma, beta, mean, var = bn
    scale = gamma / jnp.sqrt(var + eps)        # per extended output channel
    shift = beta - mean * scale
    return dense_w * scale, shift.astype(jnp.float32)


def _dense_to_band(w_dense, Win, Wout, stride, pad, mxu_dtype):
    """(Kh,Kw,Ci,Co) dense conv taps -> per-kh width-unrolled band matrices
    (Kh, Win*Ci, Wout*Co).  W padding is folded in by dropping out-of-range taps.

    TODO(synk): the band replicates the weight ~Wout times; for large W or
    channel counts, cap the unroll and grid over width tiles instead.
    """
    Kh, Kw, Ci, Co = w_dense.shape
    band = jnp.zeros((Kh, Win * Ci, Wout * Co), jnp.float32)
    for ow in range(Wout):
        for kw in range(Kw):
            iw = ow * stride + kw - pad
            if 0 <= iw < Win:
                band = band.at[:, iw * Ci:(iw + 1) * Ci,
                               ow * Co:(ow + 1) * Co].set(w_dense[:, kw])
    return band.astype(mxu_dtype)


class PackedBasicBlock:
    """JAX/Pallas mirror of torch_uncertainty BasicBlock (expansion=1)."""

    expansion = 1

    def __init__(self, key, in_planes, planes, stride=1, alpha=2,
                 num_estimators=4, gamma=1, groups=1, eps=1e-5,
                 mxu_dtype=jnp.bfloat16):
        self.stride = stride
        self.eps = eps
        self.mxu_dtype = mxu_dtype      # TODO(synk): fp8 (e4m3) weights on v7x.
        self.ext_in = int(in_planes * alpha)
        self.ext_out = int(planes * alpha * self.expansion)
        # PackedConv2d group counts: conv1 is built without gamma in the torch
        # module; conv2 / shortcut use gamma * groups * num_estimators.
        self.g1 = groups * num_estimators
        self.g2 = gamma * groups * num_estimators
        # TODO(synk): PackedConv2d's minimum_channels_per_group gamma-reduction
        # loop is not replicated (it is a no-op for the default gamma=1).
        assert self.ext_in % self.g1 == 0 and self.ext_out % self.g1 == 0
        assert self.ext_in % self.g2 == 0 and self.ext_out % self.g2 == 0
        self.has_shortcut = (stride != 1) or (in_planes != self.expansion * planes)

        ks = jax.random.split(key, 6)

        def conv_w(k, cout, cin_per_g, K):
            return 0.1 * jax.random.normal(k, (cout, cin_per_g, K, K), jnp.float32)

        def bn_params(k, c):
            k1, k2, k3, k4 = jax.random.split(k, 4)
            w = 1.0 + 0.1 * jax.random.normal(k1, (c,), jnp.float32)
            b = 0.1 * jax.random.normal(k2, (c,), jnp.float32)
            m = 0.1 * jax.random.normal(k3, (c,), jnp.float32)
            v = 0.5 + jax.random.uniform(k4, (c,), jnp.float32)
            return w, b, m, v

        # torch-layout grouped weights + BN params (used by the reference path)
        self.w1_t = conv_w(ks[0], self.ext_out, self.ext_in // self.g1, 3)
        self.bn1 = bn_params(ks[1], self.ext_out)
        self.w2_t = conv_w(ks[2], self.ext_out, self.ext_out // self.g2, 3)
        self.bn2 = bn_params(ks[3], self.ext_out)
        if self.has_shortcut:
            self.ws_t = conv_w(ks[4], self.ext_out, self.ext_in // self.g2, 1)
            self.bns = bn_params(ks[5], self.ext_out)

        self._band_cache = {}

    # kernel-layout params (built lazily per spatial size, cached)
    def _kernel_params(self, H, W):
        cache_key = (H, W)
        if cache_key in self._band_cache:
            return self._band_cache[cache_key]
        W1 = (W + 2 - 3) // self.stride + 1
        d1, s1 = _fold_bn_scale(_grouped_to_dense(self.w1_t, self.g1),
                                self.bn1, self.eps)
        d2, s2 = _fold_bn_scale(_grouped_to_dense(self.w2_t, self.g2),
                                self.bn2, self.eps)
        w1b = _dense_to_band(d1, W, W1, self.stride, 1, self.mxu_dtype)
        w2b = _dense_to_band(d2, W1, W1, 1, 1, self.mxu_dtype)
        b1r = jnp.tile(s1, W1).reshape(1, -1)
        b2r = jnp.tile(s2, W1).reshape(1, -1)
        if self.has_shortcut:
            ds, ss = _fold_bn_scale(_grouped_to_dense(self.ws_t, self.g2),
                                    self.bns, self.eps)
            wsb = _dense_to_band(ds, W, W1, self.stride, 0, self.mxu_dtype)[0]
            bsr = jnp.tile(ss, W1).reshape(1, -1)
        else:
            wsb, bsr = None, None
        params = (w1b, b1r, w2b, b2r, wsb, bsr)
        self._band_cache[cache_key] = params
        return params

    def __call__(self, x_nchw):
        N, Cin, H, W = x_nchw.shape
        assert Cin == self.ext_in
        w1b, b1r, w2b, b2r, wsb, bsr = self._kernel_params(H, W)
        # NCHW -> lane-folded (N, H, W*Cin).
        # TODO(synk): in a full network, keep activations in this folded layout
        # between blocks instead of converting at every block boundary.
        x_rows = jnp.transpose(x_nchw, (0, 2, 3, 1)).reshape(N, H, W * Cin)
        y_rows = fused_packed_basic_block(
            x_rows, w1b, b1r, w2b, b2r, wsb, bsr,
            H=H, W=W, Cin=Cin, stride=self.stride)
        H1 = (H + 2 - 3) // self.stride + 1
        W1 = (W + 2 - 3) // self.stride + 1
        y = y_rows.reshape(N, H1, W1, self.ext_out)
        return jnp.transpose(y, (0, 3, 1, 2))            # lane-folded -> NCHW

    # pure-JAX reference for verification
    def reference(self, x):
        def conv(x, w, stride, pad, groups):
            return jax.lax.conv_general_dilated(
                x, w, window_strides=(stride, stride),
                padding=((pad, pad), (pad, pad)),
                dimension_numbers=("NCHW", "OIHW", "NCHW"),
                feature_group_count=groups,
                precision=jax.lax.Precision.HIGHEST)

        def bn(x, p, eps=1e-5):
            w, b, m, v = p
            inv = 1.0 / jnp.sqrt(v + eps)
            return ((x - m[None, :, None, None]) * inv[None, :, None, None]
                    * w[None, :, None, None] + b[None, :, None, None])

        out = jax.nn.relu(bn(conv(x, self.w1_t, self.stride, 1, self.g1), self.bn1))
        out = bn(conv(out, self.w2_t, 1, 1, self.g2), self.bn2)
        if self.has_shortcut:
            sc = bn(conv(x, self.ws_t, self.stride, 0, self.g2), self.bns)
        else:
            sc = x
        return jax.nn.relu(out + sc)


if __name__ == "__main__":
    key = jax.random.PRNGKey(0)
    k1, k2, kx = jax.random.split(key, 3)

    alpha, num_estimators, gamma, groups = 2, 4, 1, 1
    x = jax.random.normal(kx, (2, 4 * alpha, 16, 16), jnp.float32)

    # bf16 MXU operands (f32 accumulation) -> tolerance looser than pure-f32.
    ATOL = RTOL = 5e-2

    # --- test 1: identity shortcut (in_planes == planes, stride 1) ------------
    blk1 = PackedBasicBlock(k1, 4, 4, stride=1, alpha=alpha,
                            num_estimators=num_estimators, gamma=gamma,
                            groups=groups)
    out1 = jax.block_until_ready(blk1(x))
    ref1 = blk1.reference(x)
    assert out1.shape == ref1.shape == (2, 8, 16, 16)
    assert bool(jnp.allclose(out1, ref1, atol=ATOL, rtol=RTOL))
    assert float(jnp.mean(jnp.abs(out1 - ref1))) < 1e-2

    # --- test 2: projection shortcut (1x1 packed conv + bn), stride 1 ---------
    blk2 = PackedBasicBlock(k2, 4, 8, stride=1, alpha=alpha,
                            num_estimators=num_estimators, gamma=gamma,
                            groups=groups)
    out2 = jax.block_until_ready(blk2(x))
    ref2 = blk2.reference(x)
    assert out2.shape == ref2.shape == (2, 16, 16, 16)
    assert bool(jnp.allclose(out2, ref2, atol=ATOL, rtol=RTOL))
    assert float(jnp.mean(jnp.abs(out2 - ref2))) < 1e-2

    print("KERNEL_OK")
</pallas_src>

<mosaic_0001>
module attributes {stable_mosaic.version = 11 : i64} {
  func.func @kernel(%arg0: i32, %arg1: memref<1x16x128xf32, #tpu.memory_space<vmem>>, %arg2: memref<3x128x128xbf16, #tpu.memory_space<vmem>>, %arg3: memref<1x128xf32, #tpu.memory_space<vmem>>, %arg4: memref<3x128x128xbf16, #tpu.memory_space<vmem>>, %arg5: memref<1x128xf32, #tpu.memory_space<vmem>>, %arg6: memref<1x16x128xf32, #tpu.memory_space<vmem>>, %arg7: memref<1x18x128xbf16, #tpu.memory_space<vmem>>, %arg8: memref<1x18x128xbf16, #tpu.memory_space<vmem>>) attributes {dimension_semantics = [#tpu.dimension_semantics<parallel>], iteration_bounds = array<i64: 2>, scalar_prefetch = 0 : i64, scratch_operands = 2 : i64, tpu.core_type = #tpu.core_type<tc>, window_params = [{transform_indices = @transform_0, window_bounds = array<i64: 1, 16, 128>}, {pipeline_mode = #tpu.pipeline_mode<synchronous>, transform_indices = @transform_1, window_bounds = array<i64: 3, 128, 128>}, {pipeline_mode = #tpu.pipeline_mode<synchronous>, transform_indices = @transform_2, window_bounds = array<i64: 1, 128>}, {pipeline_mode = #tpu.pipeline_mode<synchronous>, transform_indices = @transform_3, window_bounds = array<i64: 3, 128, 128>}, {pipeline_mode = #tpu.pipeline_mode<synchronous>, transform_indices = @transform_4, window_bounds = array<i64: 1, 128>}, {transform_indices = @transform_5, window_bounds = array<i64: 1, 16, 128>}]} {
    %cst = arith.constant 0.000000e+00 : bf16
    %0 = vector.broadcast %cst : bf16 to vector<1x1x128xbf16>
    %cst_0 = arith.constant 0.000000e+00 : bf16
    %1 = vector.broadcast %cst_0 : bf16 to vector<1x1x128xbf16>
    %c0 = arith.constant 0 : index
    %c0_1 = arith.constant 0 : index
    %c0_2 = arith.constant 0 : index
    %2 = vector.load %arg7[%c0, %c0_1, %c0_2] : memref<1x18x128xbf16, #tpu.memory_space<vmem>>, vector<1x1x128xbf16>
    tpu.vector_store %arg7[%c0, %c0_1, %c0_2], %0 {strides = array<i32>} : memref<1x18x128xbf16, #tpu.memory_space<vmem>>, vector<1x1x128xbf16>,
    %c0_3 = arith.constant 0 : index
    %c17 = arith.constant 17 : index
    %c0_4 = arith.constant 0 : index
    %3 = vector.load %arg7[%c0_3, %c17, %c0_4] : memref<1x18x128xbf16, #tpu.memory_space<vmem>>, vector<1x1x128xbf16>
    tpu.vector_store %arg7[%c0_3, %c17, %c0_4], %0 {strides = array<i32>} : memref<1x18x128xbf16, #tpu.memory_space<vmem>>, vector<1x1x128xbf16>,
    %c0_5 = arith.constant 0 : index
    %c0_6 = arith.constant 0 : index
    %c0_7 = arith.constant 0 : index
    %4 = vector.load %arg8[%c0_5, %c0_6, %c0_7] : memref<1x18x128xbf16, #tpu.memory_space<vmem>>, vector<1x1x128xbf16>
    tpu.vector_store %arg8[%c0_5, %c0_6, %c0_7], %1 {strides = array<i32>} : memref<1x18x128xbf16, #tpu.memory_space<vmem>>, vector<1x1x128xbf16>,
    %c0_8 = arith.constant 0 : index
    %c17_9 = arith.constant 17 : index
    %c0_10 = arith.constant 0 : index
    %5 = vector.load %arg8[%c0_8, %c17_9, %c0_10] : memref<1x18x128xbf16, #tpu.memory_space<vmem>>, vector<1x1x128xbf16>
    tpu.vector_store %arg8[%c0_8, %c17_9, %c0_10], %1 {strides = array<i32>} : memref<1x18x128xbf16, #tpu.memory_space<vmem>>, vector<1x1x128xbf16>,
    %c0_11 = arith.constant 0 : index
    %c0_12 = arith.constant 0 : index
    %c0_13 = arith.constant 0 : index
    %6 = vector.load %arg1[%c0_11, %c0_12, %c0_13] : memref<1x16x128xf32, #tpu.memory_space<vmem>>, vector<1x16x128xf32>
    %7 = arith.truncf %6 : vector<1x16x128xf32> to vector<1x16x128xbf16>
    %c0_14 = arith.constant 0 : index
    %c1 = arith.constant 1 : index
    %c0_15 = arith.constant 0 : index
    %8 = vector.load %arg7[%c0_14, %c1, %c0_15] : memref<1x18x128xbf16, #tpu.memory_space<vmem>>, vector<1x16x128xbf16>
    tpu.vector_store %arg7[%c0_14, %c1, %c0_15], %7 {strides = array<i32>} : memref<1x18x128xbf16, #tpu.memory_space<vmem>>, vector<1x16x128xbf16>,
    %c0_16 = arith.constant 0 : index
    %c0_17 = arith.constant 0 : index
    %9 = vector.load %arg3[%c0_16, %c0_17] : memref<1x128xf32, #tpu.memory_space<vmem>>, vector<1x128xf32>
    %c0_18 = arith.constant 0 : index
    %c0_19 = arith.constant 0 : index
    %10 = vector.load %arg5[%c0_18, %c0_19] : memref<1x128xf32, #tpu.memory_space<vmem>>, vector<1x128xf32>
    %c0_20 = arith.constant 0 : index
    %c0_21 = arith.constant 0 : index
    %c0_22 = arith.constant 0 : index
    %11 = vector.load %arg7[%c0_20, %c0_21, %c0_22] : memref<1x18x128xbf16, #tpu.memory_space<vmem>>, vector<1x16x128xbf16>
    %12 = vector.shape_cast %11 : vector<1x16x128xbf16> to vector<16x128xbf16>
    %c0_23 = arith.constant 0 : index
    %c0_24 = arith.constant 0 : index
    %c0_25 = arith.constant 0 : index
    %13 = vector.load %arg2[%c0_23, %c0_24, %c0_25] : memref<3x128x128xbf16, #tpu.memory_space<vmem>>, vector<1x128x128xbf16>
    %14 = vector.shape_cast %13 : vector<1x128x128xbf16> to vector<128x128xbf16>
    %cst_26 = arith.constant dense<0.000000e+00> : vector<16x128xf32>
    %15 = tpu.matmul %12, %14, %cst_26 {dimension_numbers = #tpu.dot_dimension_numbers<[1], [0], [0], [1], [0, 0, 1, 1], [], []>} : vector<16x128xbf16>, vector<128x128xbf16>, vector<16x128xf32> -> vector<16x128xf32>
    %c0_27 = arith.constant 0 : index
    %c1_28 = arith.constant 1 : index
    %c0_29 = arith.constant 0 : index
    %16 = vector.load %arg7[%c0_27, %c1_28, %c0_29] : memref<1x18x128xbf16, #tpu.memory_space<vmem>>, vector<1x16x128xbf16>
    %17 = vector.shape_cast %16 : vector<1x16x128xbf16> to vector<16x128xbf16>
    %c1_30 = arith.constant 1 : index
    %c0_31 = arith.constant 0 : index
    %c0_32 = arith.constant 0 : index
    %18 = vector.load %arg2[%c1_30, %c0_31, %c0_32] : memref<3x128x128xbf16, #tpu.memory_space<vmem>>, vector<1x128x128xbf16>
    %19 = vector.shape_cast %18 : vector<1x128x128xbf16> to vector<128x128xbf16>
    %cst_33 = arith.constant dense<0.000000e+00> : vector<16x128xf32>
    %20 = tpu.matmul %17, %19, %cst_33 {dimension_numbers = #tpu.dot_dimension_numbers<[1], [0], [0], [1], [0, 0, 1, 1], [], []>} : vector<16x128xbf16>, vector<128x128xbf16>, vector<16x128xf32> -> vector<16x128xf32>
    %21 = arith.addf %15, %20 : vector<16x128xf32>
    %c0_34 = arith.constant 0 : index
    %c2 = arith.constant 2 : index
    %c0_35 = arith.constant 0 : index
    %22 = vector.load %arg7[%c0_34, %c2, %c0_35] : memref<1x18x128xbf16, #tpu.memory_space<vmem>>, vector<1x16x128xbf16>
    %23 = vector.shape_cast %22 : vector<1x16x128xbf16> to vector<16x128xbf16>
    %c2_36 = arith.constant 2 : index
    %c0_37 = arith.constant 0 : index
    %c0_38 = arith.constant 0 : index
    %24 = vector.load %arg2[%c2_36, %c0_37, %c0_38] : memref<3x128x128xbf16, #tpu.memory_space<vmem>>, vector<1x128x128xbf16>
    %25 = vector.shape_cast %24 : vector<1x128x128xbf16> to vector<128x128xbf16>
    %cst_39 = arith.constant dense<0.000000e+00> : vector<16x128xf32>
    %26 = tpu.matmul %23, %25, %cst_39 {dimension_numbers = #tpu.dot_dimension_numbers<[1], [0], [0], [1], [0, 0, 1, 1], [], []>} : vector<16x128xbf16>, vector<128x128xbf16>, vector<16x128xf32> -> vector<16x128xf32>
    %27 = arith.addf %21, %26 : vector<16x128xf32>
    %28 = vector.broadcast %9 : vector<1x128xf32> to vector<16x128xf32>
    %29 = arith.addf %27, %28 : vector<16x128xf32>
    %cst_40 = arith.constant 0.000000e+00 : f32
    %30 = vector.broadcast %cst_40 : f32 to vector<16x128xf32>
    %31 = arith.maximumf %29, %30 : vector<16x128xf32>
    %32 = vector.shape_cast %31 : vector<16x128xf32> to vector<1x16x128xf32>
    %33 = arith.truncf %32 : vector<1x16x128xf32> to vector<1x16x128xbf16>
    %c0_41 = arith.constant 0 : index
    %c1_42 = arith.constant 1 : index
    %c0_43 = arith.constant 0 : index
    %34 = vector.load %arg8[%c0_41, %c1_42, %c0_43] : memref<1x18x128xbf16, #tpu.memory_space<vmem>>, vector<1x16x128xbf16>
    tpu.vector_store %arg8[%c0_41, %c1_42, %c0_43], %33 {strides = array<i32>} : memref<1x18x128xbf16, #tpu.memory_space<vmem>>, vector<1x16x128xbf16>,
    %c0_44 = arith.constant 0 : index
    %c0_45 = arith.constant 0 : index
    %c0_46 = arith.constant 0 : index
    %35 = vector.load %arg8[%c0_44, %c0_45, %c0_46] : memref<1x18x128xbf16, #tpu.memory_space<vmem>>, vector<1x16x128xbf16>
    %36 = vector.shape_cast %35 : vector<1x16x128xbf16> to vector<16x128xbf16>
    %c0_47 = arith.constant 0 : index
    %c0_48 = arith.constant 0 : index
    %c0_49 = arith.constant 0 : index
    %37 = vector.load %arg4[%c0_47, %c0_48, %c0_49] : memref<3x128x128xbf16, #tpu.memory_space<vmem>>, vector<1x128x128xbf16>
    %38 = vector.shape_cast %37 : vector<1x128x128xbf16> to vector<128x128xbf16>
    %cst_50 = arith.constant dense<0.000000e+00> : vector<16x128xf32>
    %39 = tpu.matmul %36, %38, %cst_50 {dimension_numbers = #tpu.dot_dimension_numbers<[1], [0], [0], [1], [0, 0, 1, 1], [], []>} : vector<16x128xbf16>, vector<128x128xbf16>, vector<16x128xf32> -> vector<16x128xf32>
    %c0_51 = arith.constant 0 : index
    %c1_52 = arith.constant 1 : index
    %c0_53 = arith.constant 0 : index
    %40 = vector.load %arg8[%c0_51, %c1_52, %c0_53] : memref<1x18x128xbf16, #tpu.memory_space<vmem>>, vector<1x16x128xbf16>
    %41 = vector.shape_cast %40 : vector<1x16x128xbf16> to vector<16x128xbf16>
    %c1_54 = arith.constant 1 : index
    %c0_55 = arith.constant 0 : index
    %c0_56 = arith.constant 0 : index
    %42 = vector.load %arg4[%c1_54, %c0_55, %c0_56] : memref<3x128x128xbf16, #tpu.memory_space<vmem>>, vector<1x128x128xbf16>
    %43 = vector.shape_cast %42 : vector<1x128x128xbf16> to vector<128x128xbf16>
    %cst_57 = arith.constant dense<0.000000e+00> : vector<16x128xf32>
    %44 = tpu.matmul %41, %43, %cst_57 {dimension_numbers = #tpu.dot_dimension_numbers<[1], [0], [0], [1], [0, 0, 1, 1], [], []>} : vector<16x128xbf16>, vector<128x128xbf16>, vector<16x128xf32> -> vector<16x128xf32>
    %45 = arith.addf %39, %44 : vector<16x128xf32>
    %c0_58 = arith.constant 0 : index
    %c2_59 = arith.constant 2 : index
    %c0_60 = arith.constant 0 : index
    %46 = vector.load %arg8[%c0_58, %c2_59, %c0_60] : memref<1x18x128xbf16, #tpu.memory_space<vmem>>, vector<1x16x128xbf16>
    %47 = vector.shape_cast %46 : vector<1x16x128xbf16> to vector<16x128xbf16>
    %c2_61 = arith.constant 2 : index
    %c0_62 = arith.constant 0 : index
    %c0_63 = arith.constant 0 : index
    %48 = vector.load %arg4[%c2_61, %c0_62, %c0_63] : memref<3x128x128xbf16, #tpu.memory_space<vmem>>, vector<1x128x128xbf16>
    %49 = vector.shape_cast %48 : vector<1x128x128xbf16> to vector<128x128xbf16>
    %cst_64 = arith.constant dense<0.000000e+00> : vector<16x128xf32>
    %50 = tpu.matmul %47, %49, %cst_64 {dimension_numbers = #tpu.dot_dimension_numbers<[1], [0], [0], [1], [0, 0, 1, 1], [], []>} : vector<16x128xbf16>, vector<128x128xbf16>, vector<16x128xf32> -> vector<16x128xf32>
    %51 = arith.addf %45, %50 : vector<16x128xf32>
    %52 = vector.broadcast %10 : vector<1x128xf32> to vector<16x128xf32>
    %53 = arith.addf %51, %52 : vector<16x128xf32>
    %c0_65 = arith.constant 0 : index
    %c0_66 = arith.constant 0 : index
    %c0_67 = arith.constant 0 : index
    %54 = vector.load %arg1[%c0_65, %c0_66, %c0_67] : memref<1x16x128xf32, #tpu.memory_space<vmem>>, vector<1x16x128xf32>
    %55 = vector.shape_cast %54 : vector<1x16x128xf32> to vector<16x128xf32>
    %56 = arith.addf %53, %55 : vector<16x128xf32>
    %cst_68 = arith.constant 0.000000e+00 : f32
    %57 = vector.broadcast %cst_68 : f32 to vector<16x128xf32>
    %58 = arith.maximumf %56, %57 : vector<16x128xf32>
    %59 = vector.shape_cast %58 : vector<16x128xf32> to vector<1x16x128xf32>
    %c0_69 = arith.constant 0 : index
    %c0_70 = arith.constant 0 : index
    %c0_71 = arith.constant 0 : index
    %60 = vector.load %arg6[%c0_69, %c0_70, %c0_71] : memref<1x16x128xf32, #tpu.memory_space<vmem>>, vector<1x16x128xf32>
    tpu.vector_store %arg6[%c0_69, %c0_70, %c0_71], %59 {strides = array<i32>} : memref<1x16x128xf32, #tpu.memory_space<vmem>>, vector<1x16x128xf32>,
    return
  }
  func.func @transform_0(%arg0: i32) -> (i32, i32, i32) {
    %c0_i32 = arith.constant 0 : i32
    %c0_i32_0 = arith.constant 0 : i32
    %c0_i32_1 = arith.constant 0 : i32
    return %arg0, %c0_i32, %c0_i32_0 : i32, i32, i32
  }
  func.func @transform_1(%arg0: i32) -> (i32, i32, i32) {
    %c0_i32 = arith.constant 0 : i32
    %c0_i32_0 = arith.constant 0 : i32
    %c0_i32_1 = arith.constant 0 : i32
    %c0_i32_2 = arith.constant 0 : i32
    return %c0_i32, %c0_i32_0, %c0_i32_1 : i32, i32, i32
  }
  func.func @transform_2(%arg0: i32) -> (i32, i32) {
    %c0_i32 = arith.constant 0 : i32
    %c0_i32_0 = arith.constant 0 : i32
    %c0_i32_1 = arith.constant 0 : i32
    return %c0_i32, %c0_i32_0 : i32, i32
  }
  func.func @transform_3(%arg0: i32) -> (i32, i32, i32) {
    %c0_i32 = arith.constant 0 : i32
    %c0_i32_0 = arith.constant 0 : i32
    %c0_i32_1 = arith.constant 0 : i32
    %c0_i32_2 = arith.constant 0 : i32
    return %c0_i32, %c0_i32_0, %c0_i32_1 : i32, i32, i32
  }
  func.func @transform_4(%arg0: i32) -> (i32, i32) {
    %c0_i32 = arith.constant 0 : i32
    %c0_i32_0 = arith.constant 0 : i32
    %c0_i32_1 = arith.constant 0 : i32
    return %c0_i32, %c0_i32_0 : i32, i32
  }
  func.func @transform_5(%arg0: i32) -> (i32, i32, i32) {
    %c0_i32 = arith.constant 0 : i32
    %c0_i32_0 = arith.constant 0 : i32
    %c0_i32_1 = arith.constant 0 : i32
    return %arg0, %c0_i32, %c0_i32_0 : i32, i32, i32
  }
}

</mosaic_0001>

<bundles_post_ra>
// kernel: tpu_custom_call.1
= control target key start
LH: loop header
LB: loop body
LE: loop exit
PB: predicated region body
PF: predicated region fallthrough
CT: control target
= control target key end

     0   :  { %10 = vsyncpa [#allocation5], 0  ;;  %s2153_s0 = inlined_call_operand.hbm [shape: f32[2,16,128], index: 0, kind: input, shape index: {}]   ;;  %s2154_s1 = inlined_call_operand.hbm [shape: bf16[3,128,128], index: 1, kind: input, shape index: {}]   ;;  %s2155_s2 = inlined_call_operand.vmem [shape: f32[1,128], index: 2, kind: input, shape index: {}]   ;;  %s2156_s3 = inlined_call_operand.hbm [shape: bf16[3,128,128], index: 3, kind: input, shape index: {}]   ;;  %s2157_s4 = inlined_call_operand.vmem [shape: f32[1,128], index: 4, kind: input, shape index: {}]   ;;  %s2158_s5 = inlined_call_operand.hbm [shape: f32[2,16,128], index: 5, kind: output, shape index: {}]  }
   0x1   :  { %12 = vsyncpa [#allocation5 + $0x1], 0 }
   0x2   :  { %13 = vsyncpa [#allocation8], 0 }
   0x3   :  { %14 = vsyncpa [#allocation6], 0 }
   0x4   :  { %16 = vsyncpa [#allocation6 + $0x1], 0  ;;  %s1789_s18 = smov 0   ;;  %s1791_s19 = smov 0  }
   0x5   :  { %s1793_s20 = smov 0   ;;  %s1795_s21 = smov 0  }
   0x6 LB: > { %s1810_s22 = sadd.s32 4294967295, %s1745_s21   ;;  %s1202_s23 = sadd.s32 4294967294, %s1745_s21   ;;  %s1745_s21 = sphi %s1795_s21, %s2186_s21   ;;  %s1741_s20 = sphi %s1793_s20, %s2185_s20   ;;  %s1737_s19 = sphi %s1791_s19, %s2184_s19   ;;  %s1733_s18 = sphi %s1789_s18, %s2183_s18  }
   0x7   : > { %p42_p0 = scmp.ne.s32.totalorder %s1737_s19, %s1733_s18  ;;  %p2159_p1 = scmp.eq.s32.totalorder %s1810_s22, 0 }
   0x8   : > { %p156_p3 = scmp.eq.s32.totalorder %s1202_s23, 1  ;;  %p1203_p5 = scmp.ge.s32.totalorder %s1745_s21, 1 }
   0x9   : > { %p1819_p4 = por %p2159_p1, %p42_p0  ;;  %p163_p7 = scmp.lt.s32.totalorder %s1745_s21, 3 }
   0xa   : > { %p1824_p6 = por %p156_p3, %p42_p0  ;;  %s1747_s27 = smov [#allocation7]  }
   0xb   : > { %s2162_s24 = scalar_select %p1819_p4, 1, 0 }
   0xc   : > { %s2163_s25 = scalar_select %p1824_p6, 1, 0 }
   0xd   : > { %p1829_p8 = pnand %p1203_p5, %p163_p7  ;;  %s175_s28 = sshll.u32 %s1747_s27, 4  ;;  %s1833_s28 = int_to_ptr.vmem [resolvable:$true] %s175_s28 }
   0xe   : > { %s1748_s30 = smov [#allocation9]   ;;  %s1589_s9 = scalar_lea.hbm %s2154_s1, 3072 }
   0xf   : > { %p1472_p9 = pneg %p1829_p8  ;;  %s191_s6 = sshll.u32 %s1748_s30, 4  ;;  %s1844_s6 = int_to_ptr.vmem [resolvable:$true] %s191_s6 }
  0x10   : > { %p1590_p12 = scmp.ne.s32.totalorder %s2154_s1, %s1589_s9  ;;  %p1596_p5 = scmp.lt.u32.totalorder %s1589_s9, %s2154_s1 }
  0x11   : > { %p1840_p11 = pnand %p1472_p9, %p2159_p1 }
  0x13   : > { %p1591_p13 = pneg %p1840_p11 }
  0x15   : > { %p1592_p0 = pnand %p1591_p13, %p1590_p12 }
  0x17   : > { %p1593_p3 = pneg %p1592_p0 }
  0x19   : > { %p1598_p7 = pnand %p1596_p5, %p1593_p3 }
  0x1b   : > { %1601 = shalt.err (!%p1598_p7)
}
  0x1c   : > { %s1602_s14 = scalar_lea.vmem %s1833_s28, 3072  ;;  %p1610_p2 = scmp.lt.s32.totalorder %s1833_s28, %s1833_s28 }
  0x1d   : > { %p1603_p9 = scmp.ne.s32.totalorder %s1833_s28, %s1602_s14  ;;  %p1611_p12 = scmp.lt.s32.totalorder %s1602_s14, %s1602_s14 }
  0x1f   : > { %p1605_p10 = pnand %p1603_p9, %p1591_p13  ;;  %p1612_p0 = por %p1611_p12, %p1610_p2 }
  0x21   : > { %p1606_p1 = pneg %p1605_p10 }
  0x23   : > { %p1613_p6 = pnand %p1612_p0, %p1606_p1 }
  0x25   : > { %1616 = shalt.err (!%p1613_p6)
}
  0x26   : > { %s1749_s15 = smov 64   ;;  %s1750_s16 = smov 4  }
  0x27   : > { %1475 = dma.hbm_to_vmem [thread:$0]  (!%p1840_p11), %s2154_s1, 3072, %s1833_s28, [#allocation8], %s1749_s15, %s1749_s15, %s1750_s16  }
  0x28   : > { %s1617_s7 = scalar_lea.hbm %s2156_s3, 3072 }
  0x29   : > { %p1618_p2 = scmp.ne.s32.totalorder %s2156_s3, %s1617_s7  ;;  %p1624_p10 = scmp.lt.u32.totalorder %s1617_s7, %s2156_s3 }
  0x2b   : > { %p1620_p1 = pnand %p1618_p2, %p1591_p13 }
  0x2d   : > { %p1621_p6 = pneg %p1620_p1 }
  0x2f   : > { %p1626_p3 = pnand %p1624_p10, %p1621_p6 }
  0x31   : > { %1629 = shalt.err (!%p1626_p3)
}
  0x32   : > { %s1630_s28 = scalar_lea.vmem %s1844_s6, 3072  ;;  %p1638_p12 = scmp.lt.s32.totalorder %s1844_s6, %s1844_s6 }
  0x33   : > { %p1631_p5 = scmp.ne.s32.totalorder %s1844_s6, %s1630_s28  ;;  %p1639_p0 = scmp.lt.s32.totalorder %s1630_s28, %s1630_s28 }
  0x35   : > { %p1633_p7 = pnand %p1631_p5, %p1591_p13  ;;  %p1640_p2 = por %p1639_p0, %p1638_p12 }
  0x37   : > { %p1634_p9 = pneg %p1633_p7 }
  0x39   : > { %p1641_p1 = pnand %p1640_p2, %p1634_p9 }
  0x3b   : > { %1644 = shalt.err (!%p1641_p1)
}
  0x3c   : > { %1478 = dma.hbm_to_vmem [thread:$0]  (!%p1840_p11), %s2156_s3, 3072, %s1844_s6, [#allocation8], %s1749_s15, %s1749_s15, %s1750_s16  }
  0x3d   : > { %s1899_s14 = sadd.s32 1, %s1745_s21   ;;  %s29_s29 = sadd.s32 1, %s1741_s20 }
  0x3e   : > { %s26_s17 = ssub.s32 %s1745_s21, %s1899_s14  ;;  %p36_p13 = scmp.ne.s32.totalorder %s1741_s20, %s1737_s19 }
  0x3f   : > { %p27_p6 = scmp.eq.s32.totalorder %s26_s17, 0  ;;  %p37_p10 = scmp.eq.s32.totalorder %s1745_s21, 0 }
  0x40   : > { %p2166_p3 = scmp.eq.s32.totalorder %s1810_s22, 1  ;;  %p1489_p7 = scmp.lt.s32.totalorder %s1745_s21, 2 }
  0x41   : > { %s1915_s27 = scalar_select %p27_p6, %s1741_s20, %s29_s29  }
  0x42   : > { %p1909_p5 = por %p2166_p3, %p36_p13  ;;  %p38_p9 = por %p37_p10, %p36_p13 }
  0x43   : > { %s208_s30 = sand.u32 1, %s1741_s20   ;;  %s1280_s6 = sshll.u32 %s1745_s21, 8 }
  0x44   : > { %s2167_s23 = scalar_select %p1909_p5, 1, 0 }
  0x45   : > { %s1207_s7 = sshll.u32 %s208_s30, 4  ;;  %s1922_s8 = scalar_lea.hbm %s2153_s0, %s1280_s6 }
  0x46   : > { %s212_s9 = scalar_lea.vmem [#allocation4], %s1207_s7  ;;  %p1926_p11 = pnand %p1489_p7, %p38_p9 }
  0x47   : > { %s219_s10 = sshll.u32 %s212_s9, 4  ;;  %s1930_s28 = scalar_lea.sflag [#allocation5], %s208_s30  ;;  %s1924_s10 = int_to_ptr.vmem [resolvable:$true] %s219_s10 }
  0x48   : > { %s1645_s12 = scalar_lea.hbm %s1922_s8, 256  ;;  %p1647_p0 = pneg %p1926_p11 }
  0x49   : > { %p1646_p12 = scmp.ne.s32.totalorder %s1922_s8, %s1645_s12  ;;  %s1650_s17 = scalar_lea.hbm %s2153_s0, 512 }
  0x4a   : > { %p1651_p13 = scmp.lt.u32.totalorder %s1922_s8, %s2153_s0  ;;  %p1652_p6 = scmp.lt.u32.totalorder %s1650_s17, %s1645_s12 }
  0x4b   : > { %p1648_p2 = pnand %p1647_p0, %p1646_p12  ;;  %p1654_p3 = scmp.lt.u32.totalorder %s1645_s12, %s1922_s8 }
  0x4c   : > { %p1653_p10 = por %p1652_p6, %p1651_p13 }
  0x4d   : > { %p1649_p1 = pneg %p1648_p2 }
  0x4e   : > { %p1655_p7 = por %p1654_p3, %p1653_p10 }
  0x50   : > { %p1656_p9 = pnand %p1655_p7, %p1649_p1 }
  0x52   : > { %1659 = shalt.err (!%p1656_p9)
}
  0x53   : > { %s1660_s30 = scalar_lea.vmem %s1924_s10, 256  ;;  %s1751_s15 = smov [#allocation4]  }
  0x54   : > { %p1661_p12 = scmp.ne.s32.totalorder %s1924_s10, %s1660_s30  ;;  %s1665_s16 = sshll.u32 %s1751_s15, 4  ;;  %s1666_s16 = int_to_ptr.vmem [resolvable:$false] %s1665_s16 }
  0x55   : > { %s1667_s9 = scalar_lea.vmem %s1666_s16, 512  ;;  %p1668_p4 = scmp.lt.s32.totalorder %s1924_s10, %s1666_s16 }
  0x56   : > { %p1663_p2 = pnand %p1661_p12, %p1647_p0  ;;  %p1669_p13 = scmp.lt.s32.totalorder %s1667_s9, %s1660_s30 }
  0x58   : > { %p1664_p5 = pneg %p1663_p2  ;;  %p1670_p6 = por %p1669_p13, %p1668_p4 }
  0x5a   : > { %p1671_p10 = pnand %p1670_p6, %p1664_p5 }
  0x5c   : > { %1674 = shalt.err (!%p1671_p10)
}
  0x5d   : > { %s1752_s12 = smov 128   ;;  %s1753_s13 = smov 8  }
  0x5e   : > { %1482 = dma.hbm_to_vmem [thread:$0]  (!%p1926_p11), %s1922_s8, 256, %s1924_s10, %s1930_s28, %s1752_s12, %s1752_s12, %s1753_s13  }
  0x5f   : > { %231 = sbr.rel (%p1829_p8) target bundleno = 687 (0x2af), region = 40  ;;  %s1961_s29 = sand.u32 (!%p1829_p8), 1, %s1737_s19  }
  0x60   : > { %s1211_s17 = sshll.u32 (!%p1829_p8), %s1961_s29, 4  ;;  %s234_s7 = scalar_lea.sflag (!%p1829_p8), [#allocation5], %s1961_s29 }
  0x61   : > { %s1967_s6 = scalar_lea.vmem (!%p1829_p8), [#allocation4], %s1211_s17  ;;  %p2169_p4 = scmp.ne.s32.totalorder (!%p1829_p8), %s2162_s24, 0 }
  0x66   : > { %1720 = dma.done.wait (%p2169_p4), %s234_s7, 256  }
  0x67   : > { %1722 = vsyncadd (%p2169_p4), %s234_s7, 4294967040  ;;  %p2170_p5 = scmp.eq.s32.totalorder %s1810_s22, 0 }
  0x69   : > { %1724 = dma.done.wait (%p2170_p5), [#allocation8], 6144   ;;  %p2171_p8 = pmov %p2170_p5 }
  0x6a   : > { %v1754_v0 = vmov 0.0   ;;  %vm1755_vm0 = vmmov 0   ;;  %v1535_v1 = vld [vmem:[#allocation7 + $0x40] sm:$0xff]   ;;  %v1537_v3 = vld [vmem:[#allocation7 + $0x48] sm:$0xff]   ;;  %v1539_v5 = vld [vmem:[#allocation7 + $0x50] sm:$0xff]   ;;  %vm273_vm1 = vcmask 1040384  }
  0x6b   : > { %1726 = vsyncadd (%p2171_p8), [#allocation8], 4294961152  ;;  %1340 = vmatprep.subr.bf16.mxu0 %v1754_v0  ;;  %1360 = vmatprep.subr.bf16.mxu1 %v1754_v0  ;;  %v1536_v2 = vld [vmem:[#allocation7] sm:$0xff]   ;;  %v1538_v4 = vld [vmem:[#allocation7 + $0x8] sm:$0xff]   ;;  %vm274_vm2 = vsmask.f32 256 }
  0x6c   : > { %1356 = vmatprep.mubr.msk.bf16.mxu0 %vm1755_vm0, %v1754_v0  ;;  %1376 = vmatprep.mubr.msk.bf16.mxu1 %vm1755_vm0, %v1754_v0  ;;  %v1540_v6 = vld [vmem:[#allocation7 + $0x10] sm:$0xff]   ;;  %vm279_vm3 = vsmask.f32 7938  ;;  %v1541_v7 = vld [vmem:[#allocation7 + $0x58] sm:$0xff]   ;;  %vm1990_vm4 = vmand %vm273_vm1, %vm274_vm2  ;;  %vm298_vm6 = vsmask.f32 4368 }
  0x6d   : > { %1341 = vmatpush3.bf16.msra.mxu0 %v1535_v1  ;;  %1361 = vmatpush3.bf16.msra.mxu1 %v1536_v2  ;;  %v1542_v8 = vld [vmem:[#allocation7 + $0x18] sm:$0xff]   ;;  %vm1995_vm5 = vmand %vm273_vm1, %vm279_vm3  ;;  %v1543_v11 = vld [vmem:[#allocation7 + $0x60] sm:$0xff]   ;;  %vm320_vm7 = vcmask 1043456   ;;  %vm375_vm10 = vsmask.f32 7424  ;;  %vm589_vm11 = vcmask 1046528  }
  0x6e   : > { %1342 = vmatprep.subr.bf16.mxu0 %v1754_v0  ;;  %1362 = vmatprep.subr.bf16.mxu1 %v1754_v0  ;;  %v1544_v12 = vld [vmem:[#allocation7 + $0x20] sm:$0xff]   ;;  %v276_v13 = vld [vmem:[#allocation2] sm:$0x1]  ;;  %v281_v14 = vld [vmem:[#allocation2 + $0x8] sm:$0x1]  ;;  %s271_s11 = scalar_lea.vmem [#allocation10], %s1211_s17 }
  0x6f   : > { %v2002_v15 = vld [vmem:[%s1967_s6] sm:$0xff]  ;;  %v1545_v16 = vld [vmem:[#allocation7 + $0x68] sm:$0xff]   ;;  %v277_v17 = vsel %vm1990_vm4, 0, %v276_v13  ;;  %v282_v18 = vsel %vm1995_vm5, 0, %v281_v14  ;;  %vm2019_vm8 = vmor %vm274_vm2, %vm298_vm6  ;;  %s1110_s28 = sshll.u32 %s271_s11, 4  ;;  %s1285_s30 = sshll.u32 %s1810_s22, 8  ;;  %s2103_s28 = int_to_ptr.vmem [resolvable:$true] %s1110_s28 }
  0x70   : > { %v2009_v19 = vld [vmem:[%s1967_s6 + $0x8] sm:$0xff]  ;;  %v1281_v20 = vpack.c.bf16 %v2002_v15, %v2002_v15  ;;  %278 = vst [vmem:[#allocation2] sm:$0x1] %v277_v17  ;;  %283 = vst [vmem:[#allocation2 + $0x8] sm:$0x1] %v282_v18  ;;  %v1547_v30 = vld [vmem:[#allocation7 + $0x70] sm:$0xff]   ;;  %s2109_s9 = scalar_lea.hbm %s2158_s5, %s1285_s30 }
  0x71   : > { %1343 = vmatpush3.bf16.msra.mxu0 %v1537_v3  ;;  %1363 = vmatpush3.bf16.msra.mxu1 %v1538_v4  ;;  %v1282_v21 = vpack.c.bf16 %v2009_v19, %v2009_v19  ;;  %v1546_v22 = vld [vmem:[#allocation7 + $0x28] sm:$0xff]   ;;  %vm2025_vm9 = vmand %vm320_vm7, %vm279_vm3  ;;  %v1548_v32 = vld [vmem:[#allocation7 + $0x30] sm:$0xff]   ;;  %s1097_s12 = scalar_lea.sflag [#allocation6], %s1961_s29  ;;  %s1675_s13 = scalar_lea.vmem %s2103_s28, 256 }
  0x72   : > { %1344 = vmatprep.subr.bf16.mxu0 %v1754_v0  ;;  %1364 = vmatprep.subr.bf16.mxu1 %v1754_v0  ;;  %v301_v23 = vshrl.u32 %v1281_v20, 16  ;;  %v304_v24 = vshll.u32 %v1281_v20, 16  ;;  %v1549_v35 = vld [vmem:[#allocation7 + $0x78] sm:$0xff]   ;;  %v1553_v53 = vld [vmem:[#allocation7 + $0x80] sm:$0xff]   ;;  %v1554_v56 = vld [vmem:[#allocation7 + $0x88] sm:$0xff]   ;;  %p1676_p11 = scmp.ne.s32.totalorder %s2103_s28, %s1675_s13  ;;  %p2180_p0 = scmp.ne.s32.totalorder %s2167_s23, 0 }
  0x73   : > { %v309_v26 = vshrl.u32 %v1282_v21, 16  ;;  %v312_v27 = vshll.u32 %v1282_v21, 16  ;;  %v1550_v40 = vld [vmem:[#allocation7 + $0x38] sm:$0xff]   ;;  %v1555_v57 = vld [vmem:[#allocation7 + $0x90] sm:$0xff]   ;;  %v1557_v59 = vld [vmem:[#allocation7 + $0xa0] sm:$0xff]   ;;  %s1756_s22 = smov [#allocation10]  }
  0x74   : > { %v303_v28 = vrot.slane %v301_v23, 7  ;;  %v1556_v58 = vld [vmem:[#allocation7 + $0x98] sm:$0xff]   ;;  %v1558_v60 = vld [vmem:[#allocation7 + $0xa8] sm:$0xff]   ;;  %v1559_v62 = vld [vmem:[#allocation7 + $0xb0] sm:$0xff]   ;;  %p1677_p1 = pnand %p1676_p11, %p2180_p0  ;;  %s1679_s17 = sshll.u32 %s1756_s22, 4  ;;  %s1680_s17 = int_to_ptr.vmem [resolvable:$false] %s1679_s17 }
  0x75   : > { %1345 = vmatpush3.bf16.msra.mxu0 %v1539_v5  ;;  %1365 = vmatpush3.bf16.msra.mxu1 %v1540_v6  ;;  %v311_v31 = vrot.slane %v309_v26, 7  ;;  %v1560_v1 = vld [vmem:[#allocation7 + $0xb8] sm:$0xff]   ;;  %v1562_v5 = vld [vmem:[#allocation9] sm:$0xff]   ;;  %v284_v6 = vld [vmem:[#allocation3] sm:$0x1]  ;;  %s1681_s7 = scalar_lea.vmem %s1680_s17, 512  ;;  %p1682_p7 = scmp.lt.s32.totalorder %s2103_s28, %s1680_s17 }
  0x76   : > { %1346 = vmatprep.subr.bf16.mxu0 %v1754_v0  ;;  %1366 = vmatprep.subr.bf16.mxu1 %v1754_v0  ;;  %v306_v33 = vor.u32 %v304_v24, %v303_v28  ;;  %v307_v34 = vrot.slane %v303_v28, 4  ;;  %v1566_v13 = vld [vmem:[#allocation9 + $0x48] sm:$0xff]   ;;  %v287_v14 = vld [vmem:[#allocation3 + $0x8] sm:$0x1]  ;;  %v1568_v18 = vld [vmem:[#allocation9 + $0x50] sm:$0xff]   ;;  %p1678_p3 = pneg %p1677_p1  ;;  %p1683_p9 = scmp.lt.s32.totalorder %s1681_s7, %s1675_s13 }
  0x77   : > { %v314_v36 = vor.u32 %v312_v27, %v311_v31  ;;  %v316_v37 = vrot.slane %v311_v31, 4  ;;  %v322_v38 = vld [vmem:[#allocation2] sm:$0xf]  ;;  %v326_v39 = vld [vmem:[#allocation2 + $0x8] sm:$0x1]  ;;  %v288_v17 = vsel %vm1995_vm5, 0, %v287_v14 }
  0x78   : > { %v323_v42 = vsel %vm2025_vm9, %v306_v33, %v322_v38  ;;  %289 = vst [vmem:[#allocation3 + $0x8] sm:$0x1] %v288_v17  ;;  %v1569_v20 = vld [vmem:[#allocation9 + $0x20] sm:$0xff]   ;;  %v1570_v21 = vld [vmem:[#allocation9 + $0x58] sm:$0xff]   ;;  %v1573_v23 = vld [vmem:[#allocation9 + $0x30] sm:$0xff]   ;;  %p1684_p12 = por %p1683_p9, %p1682_p7 }
  0x79   : > { %1347 = vmatpush3.bf16.msra.mxu0 %v1541_v7  ;;  %1367 = vmatpush3.bf16.msra.mxu1 %v1542_v8  ;;  %v315_v41 = vsel %vm2019_vm8, %v307_v34, %v314_v36  ;;  %v327_v43 = vsel %vm1990_vm4, %v316_v37, %v326_v39  ;;  %324 = vst [vmem:[#allocation2] sm:$0xf] %v323_v42  ;;  %v285_v7 = vsel %vm1990_vm4, 0, %v284_v6  ;;  %v1563_v8 = vld [vmem:[#allocation9 + $0x8] sm:$0xff]   ;;  %v1572_v10 = vld [vmem:[#allocation9 + $0x60] sm:$0xff]   ;;  %v1575_v26 = vld [vmem:[#allocation9 + $0x38] sm:$0xff]  }
  0x7a   : > { %1348 = vmatprep.subr.bf16.mxu0 %v1754_v0  ;;  %1368 = vmatprep.subr.bf16.mxu1 %v1754_v0  ;;  %325 = vst [vmem:[#allocation2 + $0x4] sm:$0xf] %v315_v41  ;;  %328 = vst [vmem:[#allocation2 + $0x8] sm:$0x1] %v327_v43  ;;  %v1574_v24 = vld [vmem:[#allocation9 + $0x68] sm:$0xff]   ;;  %v1576_v27 = vld [vmem:[#allocation9 + $0x70] sm:$0xff]   ;;  %p1685_p2 = pnand %p1684_p12, %p1678_p3 }
  0x7b   : > { %286 = vst [vmem:[#allocation3] sm:$0x1] %v285_v7  ;;  %v1578_v28 = vld [vmem:[#allocation9 + $0x78] sm:$0xff]   ;;  %v1580_v17 = vld [vmem:[#allocation9 + $0x80] sm:$0xff]   ;;  %v1581_v9 = vld [vmem:[#allocation9 + $0x88] sm:$0xff]  }
  0x7d   : > { %1349 = vmatpush3.bf16.msra.mxu0 %v1543_v11  ;;  %1369 = vmatpush3.bf16.msra.mxu1 %v1544_v12  ;;  %v1564_v11 = vld [vmem:[#allocation9 + $0x40] sm:$0xff]   ;;  %v1565_v12 = vld [vmem:[#allocation9 + $0x10] sm:$0xff]  }
  0x7e   : > { %1350 = vmatprep.subr.bf16.mxu0 %v1754_v0  ;;  %1370 = vmatprep.subr.bf16.mxu1 %v1754_v0 }
  0x80   : > { %v331_v44 = vld [vmem:[#allocation2] sm:$0xf] }
  0x81   : > { %1351 = vmatpush3.bf16.msra.mxu0 %v1545_v16  ;;  %1371 = vmatpush3.bf16.msra.mxu1 %v1546_v22  ;;  %v332_v45 = vld [vmem:[#allocation2 + $0x4] sm:$0xf]  ;;  %v1552_v47 = vld [vmem:[#allocation2 + $0x8] ss:$0 sps:$4 sm:$0x11]   ;;  %v1567_v16 = vld [vmem:[#allocation9 + $0x18] sm:$0xff]  }
  0x82   : > { %1352 = vmatprep.subr.bf16.mxu0 %v1754_v0  ;;  %1372 = vmatprep.subr.bf16.mxu1 %v1754_v0  ;;  %v1217_v46 = vcombine.low %v331_v44, %v332_v45  ;;  %v384_v50 = vshll.u32 %v1552_v47, 16  ;;  %v568_v61 = vld [vmem:[#allocation2] sm:$0xe]  ;;  %v591_v3 = vrot.slane %v1552_v47, 1 }
  0x83   : > { %v1235_v63 = vcombine.low %v568_v61, %v332_v45  ;;  %v1571_v22 = vld [vmem:[#allocation9 + $0x28] sm:$0xff]   ;;  %v725_v61 = vld [vmem:[#allocation3 + $0x8] sm:$0x1] }
  0x84   : > { %v377_v48 = vshrl.u32 %v1217_v46, 16  ;;  %v379_v49 = vshll.u32 %v1217_v46, 16  ;;  %v386_v52 = vrot.slane %v384_v50, 1 }
  0x85   : > { %1353 = vmatpush3.bf16.msra.mxu0 %v1547_v30  ;;  %1373 = vmatpush3.bf16.msra.mxu1 %v1548_v32  ;;  %v590_v2 = vrot.slane %v1235_v63, 1 }
  0x86   : > { %1354 = vmatprep.subr.bf16.mxu0 %v1754_v0  ;;  %1374 = vmatprep.subr.bf16.mxu1 %v1754_v0  ;;  %v381_v51 = vrot.slane %v379_v49, 1 }
  0x87   : > { %v592_v4 = vsel %vm589_vm11, %v590_v2, %v591_v3 }
  0x88   : > { %v382_v54 = vor.u32 %v381_v51, %v377_v48 }
  0x89   : > { %1355 = vmatpush3.bf16.msra.mxu0 %v1549_v35  ;;  %1375 = vmatpush3.bf16.msra.mxu1 %v1550_v40  ;;  %v1244_v40 = vld [vmem:[%s2155_s2] ss:$0 sm:$0xff] }
  0x8a   : > { %1380 = vmatprep.subr.bf16.mxu0 %v1754_v0  ;;  %1400 = vmatprep.subr.bf16.mxu1 %v1754_v0  ;;  %v387_v55 = vsel %vm375_vm10, %v382_v54, %v386_v52 }
  0x8c   : > { %1377 = vmatmul.mubr.bf16.vlgmr.msra.gmra.mrb[0].mxu1 %v1217_v46  ;;  %1357 = vmatmul.mubr.bf16.vlgmr.msra.gmra.mrb[0].mxu0 %v387_v55 }
  0x8d   : > { %1416 = vmatprep.mubr.msk.bf16.mxu1 %vm1755_vm0, %v1754_v0  ;;  %1381 = vmatpush3.bf16.msra.mxu0 %v1553_v53 }
  0x8e   : > { %1396 = vmatprep.mubr.msk.bf16.mxu0 %vm1755_vm0, %v1754_v0  ;;  %1382 = vmatprep.subr.bf16.mxu0 %v1754_v0 }
  0x8f   : > { %1401 = vmatpush3.bf16.msra.mxu1 %v1564_v11 }
  0x90   : > { %1402 = vmatprep.subr.bf16.mxu1 %v1754_v0 }
  0x91   : > { %1383 = vmatpush3.bf16.msra.mxu0 %v1554_v56 }
  0x92   : > { %1384 = vmatprep.subr.bf16.mxu0 %v1754_v0 }
  0x93   : > { %1403 = vmatpush3.bf16.msra.mxu1 %v1566_v13 }
  0x94   : > { %1404 = vmatprep.subr.bf16.mxu1 %v1754_v0 }
  0x95   : > { %1385 = vmatpush3.bf16.msra.mxu0 %v1555_v57  ;;  %v721_v57 = vld [vmem:[#allocation3] sm:$0xf] }
  0x96   : > { %1386 = vmatprep.subr.bf16.mxu0 %v1754_v0 }
  0x97   : > { %1405 = vmatpush3.bf16.msra.mxu1 %v1568_v18  ;;  %v1582_v18 = vld [vmem:[#allocation9 + $0x90] sm:$0xff]  }
  0x98   : > { %1406 = vmatprep.subr.bf16.mxu1 %v1754_v0 }
  0x99   : > { %1387 = vmatpush3.bf16.msra.mxu0 %v1556_v58 }
  0x9a   : > { %1388 = vmatprep.subr.bf16.mxu0 %v1754_v0 }
  0x9b   : > { %1407 = vmatpush3.bf16.msra.mxu1 %v1570_v21  ;;  %v1584_v21 = vld [vmem:[#allocation9 + $0xa0] sm:$0xff]  }
  0x9c   : > { %1408 = vmatprep.subr.bf16.mxu1 %v1754_v0 }
  0x9d   : > { %1389 = vmatpush3.bf16.msra.mxu0 %v1557_v59 }
  0x9e   : > { %1390 = vmatprep.subr.bf16.mxu0 %v1754_v0 }
  0x9f   : > { %1409 = vmatpush3.bf16.msra.mxu1 %v1572_v10  ;;  %v1586_v10 = vld [vmem:[#allocation9 + $0xb0] sm:$0xff]  }
  0xa0   : > { %1410 = vmatprep.subr.bf16.mxu1 %v1754_v0 }
  0xa1   : > { %1391 = vmatpush3.bf16.msra.mxu0 %v1558_v60 }
  0xa2   : > { %1392 = vmatprep.subr.bf16.mxu0 %v1754_v0 }
  0xa3   : > { %1411 = vmatpush3.bf16.msra.mxu1 %v1574_v24 }
  0xa4   : > { %1412 = vmatprep.subr.bf16.mxu1 %v1754_v0 }
  0xa5   : > { %1393 = vmatpush3.bf16.msra.mxu0 %v1559_v62 }
  0xa6   : > { %1394 = vmatprep.subr.bf16.mxu0 %v1754_v0 }
  0xa7   : > { %1413 = vmatpush3.bf16.msra.mxu1 %v1576_v27 }
  0xa8   : > { %1414 = vmatprep.subr.bf16.mxu1 %v1754_v0 }
  0xa9   : > { %1395 = vmatpush3.bf16.msra.mxu0 %v1560_v1 }
  0xaa   : > { %1420 = vmatprep.subr.bf16.mxu0 %v1754_v0 }
  0xab   : > { %1415 = vmatpush3.bf16.msra.mxu1 %v1578_v28 }
  0xac   : > { %1397 = vmatmul.mubr.bf16.vlgmr.msra.gmra.mrb[4].mxu0 %v592_v4  ;;  %1440 = vmatprep.subr.bf16.mxu1 %v1754_v0 }
  0xad   : > { %1436 = vmatprep.mubr.msk.bf16.mxu0 %vm1755_vm0, %v1754_v0  ;;  %1421 = vmatpush3.bf16.msra.mxu0 %v1562_v5 }
  0xae   : > { %1422 = vmatprep.subr.bf16.mxu0 %v1754_v0 }
  0xb1   : > { %1423 = vmatpush3.bf16.msra.mxu0 %v1563_v8 }
  0xb2   : > { %1424 = vmatprep.subr.bf16.mxu0 %v1754_v0 }
  0xb5   : > { %1425 = vmatpush3.bf16.msra.mxu0 %v1565_v12 }
  0xb6   : > { %1426 = vmatprep.subr.bf16.mxu0 %v1754_v0 }
  0xb9   : > { %1427 = vmatpush3.bf16.msra.mxu0 %v1567_v16 }
  0xba   : > { %1428 = vmatprep.subr.bf16.mxu0 %v1754_v0 }
  0xbd   : > { %1429 = vmatpush3.bf16.msra.mxu0 %v1569_v20  ;;  %v1583_v20 = vld [vmem:[#allocation9 + $0x98] sm:$0xff]  }
  0xbe   : > { %1430 = vmatprep.subr.bf16.mxu0 %v1754_v0 }
  0xc1   : > { %1431 = vmatpush3.bf16.msra.mxu0 %v1571_v22  ;;  %v1585_v22 = vld [vmem:[#allocation9 + $0xa8] sm:$0xff]  }
  0xc2   : > { %1432 = vmatprep.subr.bf16.mxu0 %v1754_v0 }
  0xc5   : > { %1433 = vmatpush3.bf16.msra.mxu0 %v1573_v23 }
  0xc6   : > { %1434 = vmatprep.subr.bf16.mxu0 %v1754_v0 }
  0xc9   : > { %1435 = vmatpush3.bf16.msra.mxu0 %v1575_v26  ;;  %v1587_v26 = vld [vmem:[#allocation9 + $0xb8] sm:$0xff]  }
 0x15f   : > { %v561_v30 = vpop.f32.mrb[0].mxu1  ;;  %v471_v34 = vpop.f32.mrb[0].mxu0 }
 0x160   : > { %v1378_v31 = vpop.f32.mrb[1].mxu1  ;;  %v562_v35 = vadd.f32 %v561_v30, %v471_v34  ;;  %v1358_v36 = vpop.f32.mrb[1].mxu0 }
 0x161   : > { %v564_v32 = vpop.f32.mrb[2].mxu1  ;;  %v474_v37 = vpop.f32.mrb[2].mxu0 }
 0x162   : > { %v1379_v33 = vpop.f32.mrb[3].mxu1  ;;  %v565_v38 = vadd.f32 %v564_v32, %v474_v37  ;;  %v1359_v39 = vpop.f32.mrb[3].mxu0 }
 0x17f   : > { %v676_v41 = vpop.f32.mrb[4].mxu0 }
 0x180   : > { %v683_v42 = vadd.f32 %v676_v41, %v562_v35  ;;  %v1398_v43 = vpop.f32.mrb[5].mxu0 }
 0x181   : > { %v679_v44 = vpop.f32.mrb[6].mxu0 }
 0x182   : > { %v691_v45 = vadd.f32 %v1244_v40, %v683_v42  ;;  %v684_v46 = vadd.f32 %v679_v44, %v565_v38  ;;  %v1399_v47 = vpop.f32.mrb[7].mxu0 }
 0x184   : > { %v693_v48 = vmax.f32 %v691_v45, 0.0  ;;  %v692_v49 = vadd.f32 %v1244_v40, %v684_v46 }
 0x186   : > { %v1283_v50 = vpack.c.bf16 %v693_v48, %v693_v48  ;;  %v694_v51 = vmax.f32 %v692_v49, 0.0 }
 0x188   : > { %v702_v52 = vshrl.u32 %v1283_v50, 16  ;;  %v1284_v53 = vpack.c.bf16 %v694_v51, %v694_v51  ;;  %v705_v55 = vshll.u32 %v1283_v50, 16 }
 0x18a   : > { %v704_v54 = vrot.slane %v702_v52, 7  ;;  %v710_v56 = vshrl.u32 %v1284_v53, 16  ;;  %v713_v60 = vshll.u32 %v1284_v53, 16 }
 0x18c   : > { %v707_v58 = vor.u32 %v705_v55, %v704_v54  ;;  %v712_v59 = vrot.slane %v710_v56, 7  ;;  %v708_v62 = vrot.slane %v704_v54, 4 }
 0x18e   : > { %v722_v63 = vsel %vm2025_vm9, %v707_v58, %v721_v57  ;;  %v715_v1 = vor.u32 %v713_v60, %v712_v59  ;;  %v717_v2 = vrot.slane %v712_v59, 4 }
 0x18f   : > { %723 = vst [vmem:[#allocation3] sm:$0xf] %v722_v63 }
 0x190   : > { %v716_v3 = vsel %vm2019_vm8, %v708_v62, %v715_v1  ;;  %v726_v4 = vsel %vm1990_vm4, %v717_v2, %v725_v61 }
 0x191   : > { %724 = vst [vmem:[#allocation3 + $0x4] sm:$0xf] %v716_v3  ;;  %727 = vst [vmem:[#allocation3 + $0x8] sm:$0x1] %v726_v4 }
 0x196   : > { %v728_v5 = vld [vmem:[#allocation3] sm:$0xf] }
 0x197   : > { %v964_v23 = vld [vmem:[#allocation3] sm:$0xe] }
 0x198   : > { %v729_v6 = vld [vmem:[#allocation3 + $0x4] sm:$0xf]  ;;  %v1579_v8 = vld [vmem:[#allocation3 + $0x8] ss:$0 sps:$4 sm:$0x11]  }
 0x199   : > { %v1247_v7 = vcombine.low %v728_v5, %v729_v6  ;;  %v780_v12 = vshll.u32 %v1579_v8, 16  ;;  %v1265_v24 = vcombine.low %v964_v23, %v729_v6  ;;  %v986_v28 = vrot.slane %v1579_v8, 1 }
 0x19b   : > { %1437 = vmatmul.mubr.bf16.vlgmr.msra.gmra.mrb[8].mxu0 %v1247_v7  ;;  %v775_v11 = vshll.u32 %v1247_v7, 16  ;;  %v773_v29 = vshrl.u32 %v1247_v7, 16  ;;  %v782_v16 = vrot.slane %v780_v12, 1  ;;  %v985_v27 = vrot.slane %v1265_v24, 1 }
 0x19d   : > { %v777_v13 = vrot.slane %v775_v11, 1  ;;  %v987_v30 = vsel %vm589_vm11, %v985_v27, %v986_v28 }
 0x19f   : > { %v778_v14 = vor.u32 %v777_v13, %v773_v29 }
 0x1a1   : > { %v783_v25 = vsel %vm375_vm10, %v778_v14, %v782_v16 }
 0x1a2   : > { %1417 = vmatmul.mubr.bf16.vlgmr.msra.gmra.mrb[4].mxu1 %v783_v25 }
 0x1a3   : > { %1441 = vmatpush3.bf16.msra.mxu1 %v1580_v17  ;;  %1456 = vmatprep.mubr.msk.bf16.mxu1 %vm1755_vm0, %v1754_v0 }
 0x1a4   : > { %1442 = vmatprep.subr.bf16.mxu1 %v1754_v0 }
 0x1a7   : > { %1443 = vmatpush3.bf16.msra.mxu1 %v1581_v9 }
 0x1a8   : > { %1444 = vmatprep.subr.bf16.mxu1 %v1754_v0 }
 0x1ab   : > { %1445 = vmatpush3.bf16.msra.mxu1 %v1582_v18 }
 0x1ac   : > { %1446 = vmatprep.subr.bf16.mxu1 %v1754_v0 }
 0x1af   : > { %1447 = vmatpush3.bf16.msra.mxu1 %v1583_v20 }
 0x1b0   : > { %1448 = vmatprep.subr.bf16.mxu1 %v1754_v0 }
 0x1b3   : > { %1449 = vmatpush3.bf16.msra.mxu1 %v1584_v21 }
 0x1b4   : > { %1450 = vmatprep.subr.bf16.mxu1 %v1754_v0 }
 0x1b7   : > { %1451 = vmatpush3.bf16.msra.mxu1 %v1585_v22 }
 0x1b8   : > { %1452 = vmatprep.subr.bf16.mxu1 %v1754_v0 }
 0x1bb   : > { %1453 = vmatpush3.bf16.msra.mxu1 %v1586_v10 }
 0x1bc   : > { %1454 = vmatprep.subr.bf16.mxu1 %v1754_v0  ;;  %v1274_v0 = vld [vmem:[%s2157_s4] ss:$0 sm:$0xff] }
 0x1bf   : > { %1455 = vmatpush3.bf16.msra.mxu1 %v1587_v26 }
 0x1c2   : > { %1457 = vmatmul.mubr.bf16.vlgmr.msra.gmra.mrb[8].mxu1 %v987_v30 }
 0x26e   : > { %v957_v31 = vpop.f32.mrb[8].mxu0 }
 0x26f   : > { %v1438_v32 = vpop.f32.mrb[9].mxu0 }
 0x270   : > { %v960_v33 = vpop.f32.mrb[10].mxu0 }
 0x271   : > { %v1439_v34 = vpop.f32.mrb[11].mxu0 }
 0x275   : > { %v867_v35 = vpop.f32.mrb[4].mxu1 }
 0x276   : > { %v958_v36 = vadd.f32 %v957_v31, %v867_v35  ;;  %v1418_v37 = vpop.f32.mrb[5].mxu1 }
 0x277   : > { %v870_v38 = vpop.f32.mrb[6].mxu1 }
 0x278   : > { %v961_v39 = vadd.f32 %v960_v33, %v870_v38  ;;  %v1419_v40 = vpop.f32.mrb[7].mxu1 }
 0x295   : > { %v1071_v41 = vpop.f32.mrb[8].mxu1 }
 0x296   : > { %v1078_v42 = vadd.f32 %v1071_v41, %v958_v36  ;;  %v1458_v43 = vpop.f32.mrb[9].mxu1 }
 0x297   : > { %v1074_v44 = vpop.f32.mrb[10].mxu1 }
 0x298   : > { %v1086_v45 = vadd.f32 %v1274_v0, %v1078_v42  ;;  %v1079_v46 = vadd.f32 %v1074_v44, %v961_v39  ;;  %v1459_v47 = vpop.f32.mrb[11].mxu1 }
 0x29a   : > { %v1090_v48 = vadd.f32 %v1086_v45, %v2002_v15  ;;  %v1087_v49 = vadd.f32 %v1274_v0, %v1079_v46 }
 0x29c   : > { %v1092_v50 = vmax.f32 %v1090_v48, 0.0  ;;  %v1091_v51 = vadd.f32 %v1087_v49, %v2009_v19 }
 0x29e   : > { %1094 = vst [vmem:[%s271_s11] sm:$0xff] %v1092_v50  ;;  %v1093_v52 = vmax.f32 %v1091_v51, 0.0 }
 0x2a0   : > { %1095 = vst [vmem:[%s271_s11 + $0x8] sm:$0xff] %v1093_v52 }
 0x2a1   : > { %1688 = shalt.err (!%p1685_p2)
}
 0x2a2   : > { %s1689_s6 = scalar_lea.hbm %s2109_s9, 256  ;;  %s1693_s8 = scalar_lea.hbm %s2158_s5, 512 }
 0x2a3   : > { %p1690_p13 = scmp.ne.s32.totalorder %s2109_s9, %s1689_s6  ;;  %p1694_p4 = scmp.lt.u32.totalorder %s2109_s9, %s2158_s5 }
 0x2a4   : > { %p1695_p5 = scmp.lt.u32.totalorder %s1693_s8, %s1689_s6  ;;  %p1697_p11 = scmp.lt.u32.totalorder %s1689_s6, %s2109_s9 }
 0x2a5   : > { %p1691_p6 = pnand %p1690_p13, %p2180_p0 }
 0x2a6   : > { %p1696_p8 = por %p1695_p5, %p1694_p4 }
 0x2a7   : > { %p1692_p10 = pneg %p1691_p6 }
 0x2a8   : > { %p1698_p1 = por %p1697_p11, %p1696_p8 }
 0x2aa   : > { %p1699_p3 = pnand %p1698_p1, %p1692_p10 }
 0x2ac   : > { %1702 = shalt.err (!%p1699_p3)
}
 0x2ad   : > { %s1757_s30 = smov 128   ;;  %s1758_s15 = smov 8  }
 0x2ae   : > { %1470 = dma.vmem_to_hbm [thread:$0]  (%p2180_p0), %s2103_s28, 256, %s2109_s9, %s1097_s12, %s1757_s30, %s1757_s30, %s1758_s15  }
 0x2af PF: > { %s1125_s16 = sand.u32 1, %s1733_s18   ;;  %p2181_p7 = scmp.ne.s32.totalorder %s2163_s25, 0 }
 0x2b0   : > { %p2182_p9 = scmp.ge.s32.totalorder %s1745_s21, 2  ;;  %s1126_s13 = scalar_lea.sflag [#allocation6], %s1125_s16 }
 0x2b2   : > { %p1484_p12 = pnand %p2182_p9, %p2181_p7 }
 0x2b4   : > { %1728 = dma.done.wait (!%p1484_p12), %s1126_s13, 256  }
 0x2b5   : > { %1730 = vsyncadd (!%p1484_p12), %s1126_s13, 4294967040  ;;  %p19_p2 = scmp.ge.s32.totalorder %s1899_s14, 4   ;;  %s2183_s18 = smov %s1737_s19 }
 0x2b6   : > { %s2184_s19 = smov %s1741_s20  ;;  %s2185_s20 = smov %s1915_s27 }
 0x2b7   : > { %s2186_s21 = smov %s1899_s14  ;;  %21 = sbr.rel (!%p19_p2) target bundleno = 6 (0x6), region = 97 }
 0x2be   :  { %1131 = vsyncpa [#allocation5], 1 }
 0x2bf   :  { %1133 = vsyncpa [#allocation5 + $0x1], 1 }
 0x2c0   :  { %1134 = vsyncpa [#allocation8], 1 }
 0x2c1   :  { %1135 = vsyncpa [#allocation6], 1 }
 0x2c2   :  { %1137 = vsyncpa [#allocation6 + $0x1], 1 }

</bundles_post_ra>
